<compile_context>
chip_gen: v6e
topology: v6e:2x2x1
jax: 0.10.0
libtpu: 0.0.40
codegen_flags: <defaults>
</compile_context>

<pallas_src>
import math

import jax
import jax.numpy as jnp
from jax.experimental import pallas as pl
from jax.experimental.pallas import tpu as pltpu


def _round_up(x, m):
    return ((x + m - 1) // m) * m


# Below this weight-matrix size the fixed pallas_call/pad/slice overheads
# dominate; a fused XLA dot+bias is strictly faster.
_BYPASS_W_BYTES = 256 * 1024


def _matmul_bias_kernel(a_ref, w_ref, b_ref, o_ref):
    """One (tm, tn) output tile; K-reduction runs over grid axis 2.

    The output tile (f32) doubles as the accumulator: its BlockSpec maps to
    the same block for every k, so it stays resident in VMEM across the
    reduction.  k==0 initializes it with partial + bias (bias added exactly
    once, no separate zeroing pass); k>0 accumulates.
    """
    k = pl.program_id(2)
    partial = jnp.dot(a_ref[...], w_ref[...],
                      preferred_element_type=jnp.float32)

    @pl.when(k == 0)
    def _():
        o_ref[...] = partial + b_ref[...]

    @pl.when(k > 0)
    def _():
        o_ref[...] += partial


def prepare_params(W, b, *, tn_max=512, tk_max=512,
                   param_dtype=jnp.float32, split_n_for_multicore=True):
    """Pad / layout the static parameters once (not per forward call).

    W: (n_bg, n_ml) f32, b: (n_ml,) f32.
    Returns a dict holding the originals (for the small-shape bypass) and the
    padded, lane-aligned versions plus the N/K tile sizes they were padded for.
    param_dtype=bfloat16 optionally halves W's HBM traffic (accumulation stays
    f32; bias and output stay f32).
    """
    n_bg, n_ml = W.shape
    assert b.shape == (n_ml,)

    # N: lane-dense output (multiple of 128).
    Np = _round_up(n_ml, 128)
    tn = Np if Np <= tn_max else tn_max
    Np = _round_up(Np, tn)
    # v7x has 2 TensorCores: if the grid would otherwise have a single N
    # block, split N in two lane-aligned blocks so both cores get work.
    if split_n_for_multicore and tn == Np and Np >= 256 and Np % 256 == 0:
        tn = Np // 2

    # K: untiled if small (block == full dim, no padding); else aligned tiles.
    if n_bg <= tk_max:
        tk, Kp = n_bg, n_bg
    else:
        tk = tk_max
        Kp = _round_up(n_bg, tk)

    W_p = W
    if (Kp, Np) != (n_bg, n_ml):
        W_p = jnp.pad(W, ((0, Kp - n_bg), (0, Np - n_ml)))
    W_p = W_p.astype(param_dtype)

    b_p = b.reshape(1, n_ml).astype(jnp.float32)
    if Np != n_ml:
        b_p = jnp.pad(b_p, ((0, 0), (0, Np - n_ml)))

    return {
        "W": W, "b": b,                 # originals (bypass path)
        "W_p": W_p, "b_p": b_p,         # padded, kernel-ready
        "n_bg": n_bg, "n_ml": n_ml,
        "Kp": Kp, "Np": Np, "tn": tn, "tk": tk,
        "param_dtype": param_dtype,
    }


def background_relation_forward(alpha_bg, params, *, tm_max=512,
                                force_pallas=False):
    """out = alpha_bg @ W + b, with W/b pre-padded by prepare_params."""
    n_bg, n_ml = params["n_bg"], params["n_ml"]
    B = alpha_bg.shape[0]
    assert alpha_bg.shape == (B, n_bg)

    # ---- small-shape bypass: XLA's fused dot+bias beats kernel launch ------
    if (not force_pallas
            and params["Kp"] * params["Np"] * 4 <= _BYPASS_W_BYTES
            and B <= 512):
        return alpha_bg @ params["W"] + params["b"]

    W_p, b_p = params["W_p"], params["b_p"]
    Kp, Np, tn, tk = params["Kp"], params["Np"], params["tn"], params["tk"]

    # M: sublane-aligned (8); single tile if it fits under tm_max.
    Mp = _round_up(B, 8)
    tm = Mp if Mp <= tm_max else tm_max
    Mp = _round_up(Mp, tm)

    # Only the activation is padded per call (zeros contribute nothing).
    a_p = alpha_bg.astype(params["param_dtype"])
    if (Mp, Kp) != (B, n_bg):
        a_p = jnp.pad(a_p, ((0, Mp - B), (0, Kp - n_bg)))

    grid = (Mp // tm, Np // tn, Kp // tk)

    itemsize = jnp.dtype(params["param_dtype"]).itemsize
    cost = pl.CostEstimate(
        flops=2 * Mp * Kp * Np,
        transcendentals=0,
        bytes_accessed=(itemsize * (Mp * Kp * (Np // tn) + Kp * Np)
                        + 4 * (Np + Mp * Np)),
    )

    out_p = pl.pallas_call(
        _matmul_bias_kernel,
        out_shape=jax.ShapeDtypeStruct((Mp, Np), jnp.float32),
        grid_spec=pltpu.PrefetchScalarGridSpec(
            num_scalar_prefetch=0,
            grid=grid,
            in_specs=[
                pl.BlockSpec((tm, tk), lambda i, j, k: (i, k)),   # A tile
                pl.BlockSpec((tk, tn), lambda i, j, k: (k, j)),   # W tile
                pl.BlockSpec((1, tn), lambda i, j, k: (0, j)),    # bias row
            ],
            out_specs=pl.BlockSpec((tm, tn), lambda i, j, k: (i, j)),
        ),
        compiler_params=pltpu.CompilerParams(
            dimension_semantics=("parallel", "parallel", "arbitrary"),
        ),
        cost_estimate=cost,
    )(a_p, W_p, b_p)

    if (Mp, Np) != (B, n_ml):
        return out_p[:B, :n_ml]
    return out_p


def init_params(key, n_bg, n_ml):
    """Deterministic parameter init mirroring the PyTorch module:
    W ~ xavier_uniform(n_bg, n_ml), b ~ randn(n_ml) / 2."""
    k_w, k_b = jax.random.split(key)
    bound = math.sqrt(6.0 / (n_bg + n_ml))  # xavier_uniform, gain=1
    W = jax.random.uniform(k_w, (n_bg, n_ml), jnp.float32, -bound, bound)
    b = jax.random.normal(k_b, (n_ml,), jnp.float32) / 2.0
    return W, b


# TODO(synk): fit/auto_fit/predict/save/load (optimizer loop, checkpointing)
# are host-side training utilities with no Pallas equivalent; only forward is
# implemented here.

if __name__ == "__main__":
    key = jax.random.PRNGKey(0)

    # --- small case matching the module's typical usage ---------------------
    batch, n_bg, n_ml = 8, 32, 16
    k_in, k_params, k2 = jax.random.split(key, 3)
    alpha_bg = jax.random.normal(k_in, (batch, n_bg), jnp.float32)
    W, b = init_params(k_params, n_bg, n_ml)
    params = prepare_params(W, b)
    ref = alpha_bg @ W + b

    # Force the Pallas path once (exercise the kernel even at tiny shapes).
    out = jax.block_until_ready(
        background_relation_forward(alpha_bg, params, force_pallas=True))
    assert out.shape == (batch, n_ml)
    assert jnp.allclose(out, ref, atol=1e-5, rtol=1e-5)

    # Default path at this size takes the small-shape bypass (fused XLA dot).
    out_bypass = jax.block_until_ready(
        background_relation_forward(alpha_bg, params))
    assert jnp.allclose(out_bypass, ref, atol=1e-5, rtol=1e-5)

    # --- odd shapes with a forced multi-tile grid: exercises activation
    #     padding, the K-reduction with in-place output accumulation, the
    #     bias-at-k==0 init, and the 2-block "parallel" N split --------------
    B2, nbg2, nml2 = 300, 200, 130
    ka, kw2 = jax.random.split(k2)
    a2 = jax.random.normal(ka, (B2, nbg2), jnp.float32)
    W2, b2 = init_params(kw2, nbg2, nml2)
    params2 = prepare_params(W2, b2, tn_max=128, tk_max=128)
    out2 = jax.block_until_ready(
        background_relation_forward(a2, params2, tm_max=128,
                                    force_pallas=True))
    ref2 = a2 @ W2 + b2
    assert out2.shape == (B2, nml2)
    assert jnp.allclose(out2, ref2, atol=1e-4, rtol=1e-4)

    print("KERNEL_OK")
</pallas_src>

<mosaic_0001>
module attributes {stable_mosaic.version = 11 : i64} {
  func.func @_matmul_bias_kernel(%arg0: i32, %arg1: i32, %arg2: i32, %arg3: memref<8x32xf32, #tpu.memory_space<vmem>>, %arg4: memref<32x128xf32, #tpu.memory_space<vmem>>, %arg5: memref<1x128xf32, #tpu.memory_space<vmem>>, %arg6: memref<8x128xf32, #tpu.memory_space<vmem>>) attributes {dimension_semantics = [#tpu.dimension_semantics<parallel>, #tpu.dimension_semantics<parallel>, #tpu.dimension_semantics<arbitrary>], iteration_bounds = array<i64: 1, 1, 1>, scalar_prefetch = 0 : i64, scratch_operands = 0 : i64, tpu.core_type = #tpu.core_type<tc>, window_params = [{transform_indices = @transform_0, window_bounds = array<i64: 8, 32>}, {transform_indices = @transform_1, window_bounds = array<i64: 32, 128>}, {transform_indices = @transform_2, window_bounds = array<i64: 1, 128>}, {transform_indices = @transform_3, window_bounds = array<i64: 8, 128>}]} {
    %c0 = arith.constant 0 : index
    %c0_0 = arith.constant 0 : index
    %0 = vector.load %arg3[%c0, %c0_0] : memref<8x32xf32, #tpu.memory_space<vmem>>, vector<8x32xf32>
    %c0_1 = arith.constant 0 : index
    %c0_2 = arith.constant 0 : index
    %1 = vector.load %arg4[%c0_1, %c0_2] : memref<32x128xf32, #tpu.memory_space<vmem>>, vector<32x128xf32>
    %cst = arith.constant dense<0.000000e+00> : vector<8x128xf32>
    %2 = tpu.matmul %0, %1, %cst {dimension_numbers = #tpu.dot_dimension_numbers<[1], [0], [0], [1], [0, 0, 1, 1], [], []>} : vector<8x32xf32>, vector<32x128xf32>, vector<8x128xf32> -> vector<8x128xf32>
    %c0_i32 = arith.constant 0 : i32
    %3 = arith.cmpi eq, %arg2, %c0_i32 : i32
    %4 = arith.extui %3 : i1 to i32
    %c0_i32_3 = arith.constant 0 : i32
    %5 = arith.cmpi ne, %4, %c0_i32_3 : i32
    scf.if %5 {
      %c0_6 = arith.constant 0 : index
      %c0_7 = arith.constant 0 : index
      %9 = vector.load %arg5[%c0_6, %c0_7] : memref<1x128xf32, #tpu.memory_space<vmem>>, vector<1x128xf32>
      %10 = vector.broadcast %9 : vector<1x128xf32> to vector<8x128xf32>
      %11 = arith.addf %2, %10 : vector<8x128xf32>
      %c0_8 = arith.constant 0 : index
      %c0_9 = arith.constant 0 : index
      %12 = vector.load %arg6[%c0_8, %c0_9] : memref<8x128xf32, #tpu.memory_space<vmem>>, vector<8x128xf32>
      tpu.vector_store %arg6[%c0_8, %c0_9], %11 {strides = array<i32>} : memref<8x128xf32, #tpu.memory_space<vmem>>, vector<8x128xf32>,
    } else {
    }
    %c0_i32_4 = arith.constant 0 : i32
    %6 = arith.cmpi sgt, %arg2, %c0_i32_4 : i32
    %7 = arith.extui %6 : i1 to i32
    %c0_i32_5 = arith.constant 0 : i32
    %8 = arith.cmpi ne, %7, %c0_i32_5 : i32
    scf.if %8 {
      %c0_6 = arith.constant 0 : index
      %c0_7 = arith.constant 0 : index
      %9 = vector.load %arg6[%c0_6, %c0_7] : memref<8x128xf32, #tpu.memory_space<vmem>>, vector<8x128xf32>
      %10 = arith.addf %9, %2 : vector<8x128xf32>
      %c0_8 = arith.constant 0 : index
      %c0_9 = arith.constant 0 : index
      %11 = vector.load %arg6[%c0_8, %c0_9] : memref<8x128xf32, #tpu.memory_space<vmem>>, vector<8x128xf32>
      tpu.vector_store %arg6[%c0_8, %c0_9], %10 {strides = array<i32>} : memref<8x128xf32, #tpu.memory_space<vmem>>, vector<8x128xf32>,
    } else {
    }
    return
  }
  func.func @transform_0(%arg0: i32, %arg1: i32, %arg2: i32) -> (i32, i32) {
    %c0_i32 = arith.constant 0 : i32
    return %arg0, %arg2 : i32, i32
  }
  func.func @transform_1(%arg0: i32, %arg1: i32, %arg2: i32) -> (i32, i32) {
    %c0_i32 = arith.constant 0 : i32
    return %arg2, %arg1 : i32, i32
  }
  func.func @transform_2(%arg0: i32, %arg1: i32, %arg2: i32) -> (i32, i32) {
    %c0_i32 = arith.constant 0 : i32
    %c0_i32_0 = arith.constant 0 : i32
    return %c0_i32, %arg1 : i32, i32
  }
  func.func @transform_3(%arg0: i32, %arg1: i32, %arg2: i32) -> (i32, i32) {
    %c0_i32 = arith.constant 0 : i32
    return %arg0, %arg1 : i32, i32
  }
}

</mosaic_0001>

<bundles_post_ra>
// kernel: tpu_custom_call.1
= control target key start
LH: loop header
LB: loop body
LE: loop exit
PB: predicated region body
PF: predicated region fallthrough
CT: control target
= control target key end

     0   :  { %8 = vsyncpa [#allocation3], 0  ;;  %s286_s0 = inlined_call_operand.hbm [shape: f32[8,32], index: 0, kind: input, shape index: {}]   ;;  %s287_s1 = inlined_call_operand.hbm [shape: f32[32,128], index: 1, kind: input, shape index: {}]   ;;  %s288_s2 = inlined_call_operand.vmem [shape: f32[1,128], index: 2, kind: input, shape index: {}]   ;;  %s289_s3 = inlined_call_operand.hbm [shape: f32[8,128], index: 3, kind: output, shape index: {}]  }
   0x1   :  { %9 = vsyncpa [#allocation6], 0 }
   0x2   :  { %10 = vsyncpa [#allocation4], 0  ;;  %s247_s12 = smov [#allocation2]   ;;  %s248_s14 = smov [#allocation5]  }
   0x3   :  { %s17_s13 = sshll.u32 %s247_s12, 4  ;;  %s26_s15 = sshll.u32 %s248_s14, 4  ;;  %s18_s13 = int_to_ptr.vmem [resolvable:$true] %s17_s13  ;;  %s27_s15 = int_to_ptr.vmem [resolvable:$true] %s26_s15 }
   0x4   :  { %s189_s16 = scalar_lea.vmem %s18_s13, 128  ;;  %p194_p1 = scmp.lt.s32.totalorder %s18_s13, %s18_s13 }
   0x5   :  { %p190_p0 = scmp.ne.s32.totalorder %s18_s13, %s189_s16  ;;  %p195_p2 = scmp.lt.s32.totalorder %s189_s16, %s189_s16 }
   0x7   :  { %p196_p3 = por %p195_p2, %p194_p1 }
   0x9   :  { %p197_p4 = pnand %p196_p3, %p190_p0 }
   0xb   :  { %200 = shalt.err (!%p197_p4)
}
   0xc   :  { %20 = dma.hbm_to_vmem [thread:$0]  %s286_s0, 128, %s18_s13, [#allocation3]  }
   0xd   :  { %s209_s19 = scalar_lea.vmem %s27_s15, 512  ;;  %p214_p6 = scmp.lt.s32.totalorder %s27_s15, %s27_s15 }
   0xe   :  { %p210_p5 = scmp.ne.s32.totalorder %s27_s15, %s209_s19  ;;  %p215_p7 = scmp.lt.s32.totalorder %s209_s19, %s209_s19 }
  0x10   :  { %p216_p8 = por %p215_p7, %p214_p6 }
  0x12   :  { %p217_p9 = pnand %p216_p8, %p210_p5 }
  0x14   :  { %220 = shalt.err (!%p217_p9)
}
  0x15   :  { %s249_s20 = smov 128   ;;  %s250_s21 = smov 8  }
  0x16   :  { %32 = dma.hbm_to_vmem [thread:$0]  %s287_s1, 512, %s27_s15, [#allocation6], %s249_s20, %s249_s20, %s250_s21  }
  0x17   :  { %241 = dma.done.wait [#allocation3], 128  }
  0x18   :  { %242 = vsyncadd [#allocation3], 4294967168 }
  0x19   :  { %243 = dma.done.wait [#allocation6], 512  }
  0x1a   :  { %244 = vsyncadd [#allocation6], 4294966784  ;;  %v251_v0 = vmov 0.0   ;;  %vm252_vm0 = vmmov 0   ;;  %v45_v1 = vld [vmem:[#allocation5 + $0x18] sm:$0xff]  ;;  %v44_v2 = vld [vmem:[#allocation5 + $0x10] sm:$0xff] }
  0x1b   :  { %163 = vmatprep.subr.mxu0 %v251_v0  ;;  %171 = vmatprep.mubr.msk.f32.mxu0 %vm252_vm0, %v251_v0  ;;  %v43_v3 = vld [vmem:[#allocation5 + $0x8] sm:$0xff]  ;;  %v42_v4 = vld [vmem:[#allocation5] sm:$0xff]  ;;  %v41_v5 = vld [vmem:[#allocation2] sm:$0xff]  ;;  %vm46_vm1 = vcmask 261120   ;;  %s253_s24 = smov [#allocation7]  }
  0x1c   :  { %164 = vmatpush3.msra.mxu0 %v45_v1  ;;  %v157_v6 = vld [vmem:[%s288_s2] ss:$0 sm:$0xff]  ;;  %s146_s25 = sshll.u32 %s253_s24, 4  ;;  %s147_s25 = int_to_ptr.vmem [resolvable:$true] %s146_s25 }
  0x1d   :  { %165 = vmatprep.subr.mxu0 %v251_v0  ;;  %s221_s26 = scalar_lea.vmem %s147_s25, 128  ;;  %p226_p11 = scmp.lt.s32.totalorder %s147_s25, %s147_s25 }
  0x1e   :  { %166 = vmatpush3.msra.mxu0 %v44_v2  ;;  %p222_p10 = scmp.ne.s32.totalorder %s147_s25, %s221_s26  ;;  %p227_p12 = scmp.lt.s32.totalorder %s221_s26, %s221_s26 }
  0x1f   :  { %167 = vmatprep.subr.mxu0 %v251_v0 }
  0x20   :  { %168 = vmatpush3.msra.mxu0 %v43_v3  ;;  %p228_p13 = por %p227_p12, %p226_p11 }
  0x21   :  { %169 = vmatprep.subr.mxu0 %v251_v0 }
  0x22   :  { %170 = vmatpush3.msra.mxu0 %v42_v4  ;;  %p229_p0 = pnand %p228_p13, %p222_p10 }
  0x23   :  { %172 = vmatmul.mubr.msk.f32.vlgmr.msra.gmra.mxu0 %vm46_vm1, %v41_v5 }
  0xe3   :  { %v116_v7 = vpop.f32.mrf.mxu0 }
  0xe4   :  { %v131_v8 = vadd.f32 %v157_v6, %v116_v7 }
  0xe5   :  { %v173_v9 = vpop.f32.mrf.mxu0 }
  0xe6   :  { %132 = vst [vmem:[#allocation7] sm:$0xff] %v131_v8 }
  0xe7   :  { %232 = shalt.err (!%p229_p0)
}
  0xe8   :  { %149 = dma.vmem_to_hbm [thread:$0]  %s147_s25, 128, %s289_s3, [#allocation4]  }
  0xe9   :  { %245 = dma.done.wait [#allocation4], 128  }
  0xea   :  { %246 = vsyncadd [#allocation4], 4294967168 }
  0xeb   :  { %153 = vsyncpa [#allocation3], 1 }
  0xec   :  { %154 = vsyncpa [#allocation6], 1 }
  0xed   :  { %155 = vsyncpa [#allocation4], 1 }

</bundles_post_ra>
